<compile_context>
chip_gen: v5e
topology: v5e:2x2
jax: 0.10.0
libtpu: 0.0.40
codegen_flags: <defaults>
</compile_context>

<pallas_src>
import jax
import jax.numpy as jnp
from jax.experimental import pallas as pl
from jax.experimental.pallas import tpu as pltpu

LANES = 128           # vreg lane width
SUBLANES = 8          # f32 sublane count
MAX_TILE_ROWS = 1024  # 1024 x 128 = 128K batch elems / step (~3 MiB double-buffered)


def mlp_kernel(w1_ref, b1_ref, w2_ref, b2_ref, x_ref, o_ref):
    # SMEM scalar-prefetch refs (sigmoid affine constants pre-folded on host):
    #   w1_ref: (16,)  0.5 * fc1.weight, row-major: [2*j + k] = 0.5 * W1[j, k]
    #   b1_ref: (8,)   0.5 * fc1.bias
    #   w2_ref: (8,)   0.25 * fc2.weight
    #   b2_ref: (1,)   0.25 * sum(fc2.weight) + 0.5 * fc2.bias
    # VMEM refs (batch on lanes AND sublanes):
    #   x_ref:  (2, R, 128)  feature-major input tile
    #   o_ref:  (R, 128)     lane/sublane-dense output tile
    x0 = x_ref[0]  # (R, 128)
    x1 = x_ref[1]  # (R, 128)

    acc = None
    # fc1 (2->8) -> sigmoid -> fc2 (8->1), fully unrolled as VPU broadcast-FMAs.
    # sigmoid(z) = 0.5*tanh(0.5*z) + 0.5; the 0.5's are folded into w1/b1/w2/b2,
    # leaving one EUP tanh per hidden activation.
    for j in range(8):
        t_j = jnp.tanh(w1_ref[2 * j] * x0 + w1_ref[2 * j + 1] * x1 + b1_ref[j])
        if acc is None:
            acc = w2_ref[j] * t_j + b2_ref[0]  # output bias folded into first term
        else:
            acc = acc + w2_ref[j] * t_j

    # Output sigmoid (0.5*y already folded into w2''/b2'').
    o_ref[...] = (0.5 * jnp.tanh(acc) + 0.5).astype(o_ref.dtype)


def binary_classification_net(x, fc1_w, fc1_b, fc2_w, fc2_b, *, tile_rows=None):
    """Forward pass matching the PyTorch module.

    x: (B, 2) f32
    fc1_w: (8, 2), fc1_b: (8,), fc2_w: (1, 8), fc2_b: (1,)  (PyTorch layouts)
    returns: (B, 1) f32
    """
    B = x.shape[0]

    # --- tile selection: sublane+lane dense (R, 128) tiles, R a multiple of 8.
    rows_needed = pl.cdiv(B, LANES)
    if tile_rows is None:
        # Prefer >= 2 grid steps (so v7x's two TensorCores both get work) while
        # capping the per-step footprint (VMEM-safe on every generation).
        half_rows = pl.cdiv(rows_needed, 2)
        tile_rows = min(
            MAX_TILE_ROWS,
            max(SUBLANES, pl.cdiv(half_rows, SUBLANES) * SUBLANES),
        )
    if tile_rows % SUBLANES != 0:
        raise ValueError(f"tile_rows must be a multiple of {SUBLANES}, got {tile_rows}")
    tile_b = tile_rows * LANES
    n_tiles = pl.cdiv(B, tile_b)
    b_pad = n_tiles * tile_b          # padding bounded to < one tile
    total_rows = n_tiles * tile_rows

    # --- fold sigmoid affine constants into the weights (host side, free).
    w1_f = (0.5 * fc1_w.reshape(-1)).astype(jnp.float32)   # (16,)
    b1_f = (0.5 * fc1_b.reshape(-1)).astype(jnp.float32)   # (8,)
    w2_row = fc2_w.reshape(-1).astype(jnp.float32)         # (8,)
    w2_f = (0.25 * w2_row).astype(jnp.float32)              # (8,)
    b2_f = (0.25 * jnp.sum(w2_row) + 0.5 * fc2_b.reshape(-1)).astype(jnp.float32)  # (1,)

    # --- feature-major, lane/sublane-dense input: (2, total_rows, 128).
    x_t = x.astype(jnp.float32).T                   # (2, B)
    if b_pad != B:
        x_t = jnp.pad(x_t, ((0, 0), (0, b_pad - B)))
    x_t = x_t.reshape(2, total_rows, LANES)

    grid_spec = pltpu.PrefetchScalarGridSpec(
        num_scalar_prefetch=4,                       # weights/biases live in SMEM
        grid=(n_tiles,),
        in_specs=[pl.BlockSpec((2, tile_rows, LANES), lambda i, *_: (0, i, 0))],
        out_specs=pl.BlockSpec((tile_rows, LANES), lambda i, *_: (i, 0)),
    )

    out = pl.pallas_call(
        mlp_kernel,
        out_shape=jax.ShapeDtypeStruct((total_rows, LANES), jnp.float32),
        grid_spec=grid_spec,
        compiler_params=pltpu.CompilerParams(
            dimension_semantics=("parallel",),       # shard batch tiles across TCs (v7x)
        ),
        cost_estimate=pl.CostEstimate(
            flops=50 * b_pad,            # ~50 VALU ops / element after folding
            transcendentals=9 * b_pad,   # 8 hidden + 1 output tanh / element
            bytes_accessed=12 * b_pad,   # 8 B in + 4 B out / element
        ),
    )(w1_f, b1_f, w2_f, b2_f, x_t)

    # Padded columns hold garbage activations of zero inputs; slice them off.
    return out.reshape(-1)[:B].reshape(B, 1)


def init_params(key):
    k1, k2, k3, k4 = jax.random.split(key, 4)
    fc1_w = jax.random.uniform(k1, (8, 2), jnp.float32, -0.5, 0.5)
    fc1_b = jax.random.uniform(k2, (8,), jnp.float32, -0.5, 0.5)
    fc2_w = jax.random.uniform(k3, (1, 8), jnp.float32, -0.3, 0.3)
    fc2_b = jax.random.uniform(k4, (1,), jnp.float32, -0.3, 0.3)
    return fc1_w, fc1_b, fc2_w, fc2_b


def reference_forward(x, fc1_w, fc1_b, fc2_w, fc2_b):
    h = jax.nn.sigmoid(x @ fc1_w.T + fc1_b)
    return jax.nn.sigmoid(h @ fc2_w.T + fc2_b)


if __name__ == "__main__":
    key = jax.random.PRNGKey(0)
    kx1, kx2, kp = jax.random.split(key, 3)
    fc1_w, fc1_b, fc2_w, fc2_b = init_params(kp)

    # Small batch (single tile) and a batch that exercises padding + 2 grid steps.
    for batch, kx in ((8, kx1), (1500, kx2)):
        x = jax.random.normal(kx, (batch, 2), jnp.float32)
        out = binary_classification_net(x, fc1_w, fc1_b, fc2_w, fc2_b)
        out = jax.block_until_ready(out)
        ref = reference_forward(x, fc1_w, fc1_b, fc2_w, fc2_b)
        assert out.shape == (batch, 1)
        assert jnp.allclose(out, ref, atol=1e-5, rtol=1e-5)

    print("KERNEL_OK")
</pallas_src>

<mosaic_0001>
module attributes {stable_mosaic.version = 11 : i64} {
  func.func @mlp_kernel(%arg0: i32, %arg1: memref<16xf32, #tpu.memory_space<smem>>, %arg2: memref<8xf32, #tpu.memory_space<smem>>, %arg3: memref<8xf32, #tpu.memory_space<smem>>, %arg4: memref<1xf32, #tpu.memory_space<smem>>, %arg5: memref<2x8x128xf32, #tpu.memory_space<vmem>>, %arg6: memref<8x128xf32, #tpu.memory_space<vmem>>) attributes {dimension_semantics = [#tpu.dimension_semantics<parallel>], iteration_bounds = array<i64: 1>, scalar_prefetch = 4 : i64, scratch_operands = 0 : i64, tpu.core_type = #tpu.core_type<tc>, window_params = [{transform_indices = @transform_0, window_bounds = array<i64: 2, 8, 128>}, {transform_indices = @transform_1, window_bounds = array<i64: 8, 128>}]} {
    %c0 = arith.constant 0 : index
    %c0_0 = arith.constant 0 : index
    %c0_1 = arith.constant 0 : index
    %0 = vector.load %arg5[%c0, %c0_0, %c0_1] : memref<2x8x128xf32, #tpu.memory_space<vmem>>, vector<1x8x128xf32>
    %1 = vector.shape_cast %0 : vector<1x8x128xf32> to vector<8x128xf32>
    %c1 = arith.constant 1 : index
    %c0_2 = arith.constant 0 : index
    %c0_3 = arith.constant 0 : index
    %2 = vector.load %arg5[%c1, %c0_2, %c0_3] : memref<2x8x128xf32, #tpu.memory_space<vmem>>, vector<1x8x128xf32>
    %3 = vector.shape_cast %2 : vector<1x8x128xf32> to vector<8x128xf32>
    %c0_4 = arith.constant 0 : index
    %4 = memref.load %arg1[%c0_4] : memref<16xf32, #tpu.memory_space<smem>>
    %5 = vector.broadcast %4 : f32 to vector<8x128xf32>
    %6 = arith.mulf %5, %1 : vector<8x128xf32>
    %c1_5 = arith.constant 1 : index
    %7 = memref.load %arg1[%c1_5] : memref<16xf32, #tpu.memory_space<smem>>
    %8 = vector.broadcast %7 : f32 to vector<8x128xf32>
    %9 = arith.mulf %8, %3 : vector<8x128xf32>
    %10 = arith.addf %6, %9 : vector<8x128xf32>
    %c0_6 = arith.constant 0 : index
    %11 = memref.load %arg2[%c0_6] : memref<8xf32, #tpu.memory_space<smem>>
    %12 = vector.broadcast %11 : f32 to vector<8x128xf32>
    %13 = arith.addf %10, %12 : vector<8x128xf32>
    %14 = math.tanh %13 : vector<8x128xf32>
    %c0_7 = arith.constant 0 : index
    %15 = memref.load %arg3[%c0_7] : memref<8xf32, #tpu.memory_space<smem>>
    %16 = vector.broadcast %15 : f32 to vector<8x128xf32>
    %17 = arith.mulf %16, %14 : vector<8x128xf32>
    %c0_8 = arith.constant 0 : index
    %18 = memref.load %arg4[%c0_8] : memref<1xf32, #tpu.memory_space<smem>>
    %19 = vector.broadcast %18 : f32 to vector<8x128xf32>
    %20 = arith.addf %17, %19 : vector<8x128xf32>
    %c2 = arith.constant 2 : index
    %21 = memref.load %arg1[%c2] : memref<16xf32, #tpu.memory_space<smem>>
    %22 = vector.broadcast %21 : f32 to vector<8x128xf32>
    %23 = arith.mulf %22, %1 : vector<8x128xf32>
    %c3 = arith.constant 3 : index
    %24 = memref.load %arg1[%c3] : memref<16xf32, #tpu.memory_space<smem>>
    %25 = vector.broadcast %24 : f32 to vector<8x128xf32>
    %26 = arith.mulf %25, %3 : vector<8x128xf32>
    %27 = arith.addf %23, %26 : vector<8x128xf32>
    %c1_9 = arith.constant 1 : index
    %28 = memref.load %arg2[%c1_9] : memref<8xf32, #tpu.memory_space<smem>>
    %29 = vector.broadcast %28 : f32 to vector<8x128xf32>
    %30 = arith.addf %27, %29 : vector<8x128xf32>
    %31 = math.tanh %30 : vector<8x128xf32>
    %c1_10 = arith.constant 1 : index
    %32 = memref.load %arg3[%c1_10] : memref<8xf32, #tpu.memory_space<smem>>
    %33 = vector.broadcast %32 : f32 to vector<8x128xf32>
    %34 = arith.mulf %33, %31 : vector<8x128xf32>
    %35 = arith.addf %20, %34 : vector<8x128xf32>
    %c4 = arith.constant 4 : index
    %36 = memref.load %arg1[%c4] : memref<16xf32, #tpu.memory_space<smem>>
    %37 = vector.broadcast %36 : f32 to vector<8x128xf32>
    %38 = arith.mulf %37, %1 : vector<8x128xf32>
    %c5 = arith.constant 5 : index
    %39 = memref.load %arg1[%c5] : memref<16xf32, #tpu.memory_space<smem>>
    %40 = vector.broadcast %39 : f32 to vector<8x128xf32>
    %41 = arith.mulf %40, %3 : vector<8x128xf32>
    %42 = arith.addf %38, %41 : vector<8x128xf32>
    %c2_11 = arith.constant 2 : index
    %43 = memref.load %arg2[%c2_11] : memref<8xf32, #tpu.memory_space<smem>>
    %44 = vector.broadcast %43 : f32 to vector<8x128xf32>
    %45 = arith.addf %42, %44 : vector<8x128xf32>
    %46 = math.tanh %45 : vector<8x128xf32>
    %c2_12 = arith.constant 2 : index
    %47 = memref.load %arg3[%c2_12] : memref<8xf32, #tpu.memory_space<smem>>
    %48 = vector.broadcast %47 : f32 to vector<8x128xf32>
    %49 = arith.mulf %48, %46 : vector<8x128xf32>
    %50 = arith.addf %35, %49 : vector<8x128xf32>
    %c6 = arith.constant 6 : index
    %51 = memref.load %arg1[%c6] : memref<16xf32, #tpu.memory_space<smem>>
    %52 = vector.broadcast %51 : f32 to vector<8x128xf32>
    %53 = arith.mulf %52, %1 : vector<8x128xf32>
    %c7 = arith.constant 7 : index
    %54 = memref.load %arg1[%c7] : memref<16xf32, #tpu.memory_space<smem>>
    %55 = vector.broadcast %54 : f32 to vector<8x128xf32>
    %56 = arith.mulf %55, %3 : vector<8x128xf32>
    %57 = arith.addf %53, %56 : vector<8x128xf32>
    %c3_13 = arith.constant 3 : index
    %58 = memref.load %arg2[%c3_13] : memref<8xf32, #tpu.memory_space<smem>>
    %59 = vector.broadcast %58 : f32 to vector<8x128xf32>
    %60 = arith.addf %57, %59 : vector<8x128xf32>
    %61 = math.tanh %60 : vector<8x128xf32>
    %c3_14 = arith.constant 3 : index
    %62 = memref.load %arg3[%c3_14] : memref<8xf32, #tpu.memory_space<smem>>
    %63 = vector.broadcast %62 : f32 to vector<8x128xf32>
    %64 = arith.mulf %63, %61 : vector<8x128xf32>
    %65 = arith.addf %50, %64 : vector<8x128xf32>
    %c8 = arith.constant 8 : index
    %66 = memref.load %arg1[%c8] : memref<16xf32, #tpu.memory_space<smem>>
    %67 = vector.broadcast %66 : f32 to vector<8x128xf32>
    %68 = arith.mulf %67, %1 : vector<8x128xf32>
    %c9 = arith.constant 9 : index
    %69 = memref.load %arg1[%c9] : memref<16xf32, #tpu.memory_space<smem>>
    %70 = vector.broadcast %69 : f32 to vector<8x128xf32>
    %71 = arith.mulf %70, %3 : vector<8x128xf32>
    %72 = arith.addf %68, %71 : vector<8x128xf32>
    %c4_15 = arith.constant 4 : index
    %73 = memref.load %arg2[%c4_15] : memref<8xf32, #tpu.memory_space<smem>>
    %74 = vector.broadcast %73 : f32 to vector<8x128xf32>
    %75 = arith.addf %72, %74 : vector<8x128xf32>
    %76 = math.tanh %75 : vector<8x128xf32>
    %c4_16 = arith.constant 4 : index
    %77 = memref.load %arg3[%c4_16] : memref<8xf32, #tpu.memory_space<smem>>
    %78 = vector.broadcast %77 : f32 to vector<8x128xf32>
    %79 = arith.mulf %78, %76 : vector<8x128xf32>
    %80 = arith.addf %65, %79 : vector<8x128xf32>
    %c10 = arith.constant 10 : index
    %81 = memref.load %arg1[%c10] : memref<16xf32, #tpu.memory_space<smem>>
    %82 = vector.broadcast %81 : f32 to vector<8x128xf32>
    %83 = arith.mulf %82, %1 : vector<8x128xf32>
    %c11 = arith.constant 11 : index
    %84 = memref.load %arg1[%c11] : memref<16xf32, #tpu.memory_space<smem>>
    %85 = vector.broadcast %84 : f32 to vector<8x128xf32>
    %86 = arith.mulf %85, %3 : vector<8x128xf32>
    %87 = arith.addf %83, %86 : vector<8x128xf32>
    %c5_17 = arith.constant 5 : index
    %88 = memref.load %arg2[%c5_17] : memref<8xf32, #tpu.memory_space<smem>>
    %89 = vector.broadcast %88 : f32 to vector<8x128xf32>
    %90 = arith.addf %87, %89 : vector<8x128xf32>
    %91 = math.tanh %90 : vector<8x128xf32>
    %c5_18 = arith.constant 5 : index
    %92 = memref.load %arg3[%c5_18] : memref<8xf32, #tpu.memory_space<smem>>
    %93 = vector.broadcast %92 : f32 to vector<8x128xf32>
    %94 = arith.mulf %93, %91 : vector<8x128xf32>
    %95 = arith.addf %80, %94 : vector<8x128xf32>
    %c12 = arith.constant 12 : index
    %96 = memref.load %arg1[%c12] : memref<16xf32, #tpu.memory_space<smem>>
    %97 = vector.broadcast %96 : f32 to vector<8x128xf32>
    %98 = arith.mulf %97, %1 : vector<8x128xf32>
    %c13 = arith.constant 13 : index
    %99 = memref.load %arg1[%c13] : memref<16xf32, #tpu.memory_space<smem>>
    %100 = vector.broadcast %99 : f32 to vector<8x128xf32>
    %101 = arith.mulf %100, %3 : vector<8x128xf32>
    %102 = arith.addf %98, %101 : vector<8x128xf32>
    %c6_19 = arith.constant 6 : index
    %103 = memref.load %arg2[%c6_19] : memref<8xf32, #tpu.memory_space<smem>>
    %104 = vector.broadcast %103 : f32 to vector<8x128xf32>
    %105 = arith.addf %102, %104 : vector<8x128xf32>
    %106 = math.tanh %105 : vector<8x128xf32>
    %c6_20 = arith.constant 6 : index
    %107 = memref.load %arg3[%c6_20] : memref<8xf32, #tpu.memory_space<smem>>
    %108 = vector.broadcast %107 : f32 to vector<8x128xf32>
    %109 = arith.mulf %108, %106 : vector<8x128xf32>
    %110 = arith.addf %95, %109 : vector<8x128xf32>
    %c14 = arith.constant 14 : index
    %111 = memref.load %arg1[%c14] : memref<16xf32, #tpu.memory_space<smem>>
    %112 = vector.broadcast %111 : f32 to vector<8x128xf32>
    %113 = arith.mulf %112, %1 : vector<8x128xf32>
    %c15 = arith.constant 15 : index
    %114 = memref.load %arg1[%c15] : memref<16xf32, #tpu.memory_space<smem>>
    %115 = vector.broadcast %114 : f32 to vector<8x128xf32>
    %116 = arith.mulf %115, %3 : vector<8x128xf32>
    %117 = arith.addf %113, %116 : vector<8x128xf32>
    %c7_21 = arith.constant 7 : index
    %118 = memref.load %arg2[%c7_21] : memref<8xf32, #tpu.memory_space<smem>>
    %119 = vector.broadcast %118 : f32 to vector<8x128xf32>
    %120 = arith.addf %117, %119 : vector<8x128xf32>
    %121 = math.tanh %120 : vector<8x128xf32>
    %c7_22 = arith.constant 7 : index
    %122 = memref.load %arg3[%c7_22] : memref<8xf32, #tpu.memory_space<smem>>
    %123 = vector.broadcast %122 : f32 to vector<8x128xf32>
    %124 = arith.mulf %123, %121 : vector<8x128xf32>
    %125 = arith.addf %110, %124 : vector<8x128xf32>
    %126 = math.tanh %125 : vector<8x128xf32>
    %cst = arith.constant 5.000000e-01 : f32
    %127 = vector.broadcast %cst : f32 to vector<8x128xf32>
    %128 = arith.mulf %127, %126 : vector<8x128xf32>
    %cst_23 = arith.constant 5.000000e-01 : f32
    %129 = vector.broadcast %cst_23 : f32 to vector<8x128xf32>
    %130 = arith.addf %128, %129 : vector<8x128xf32>
    %c0_24 = arith.constant 0 : index
    %c0_25 = arith.constant 0 : index
    %131 = vector.load %arg6[%c0_24, %c0_25] : memref<8x128xf32, #tpu.memory_space<vmem>>, vector<8x128xf32>
    tpu.vector_store %arg6[%c0_24, %c0_25], %130 {strides = array<i32>} : memref<8x128xf32, #tpu.memory_space<vmem>>, vector<8x128xf32>,
    return
  }
  func.func @transform_0(%arg0: i32, %arg1: memref<16xf32, #tpu.memory_space<smem>>, %arg2: memref<8xf32, #tpu.memory_space<smem>>, %arg3: memref<8xf32, #tpu.memory_space<smem>>, %arg4: memref<1xf32, #tpu.memory_space<smem>>) -> (i32, i32, i32) {
    %c0_i32 = arith.constant 0 : i32
    %c0_i32_0 = arith.constant 0 : i32
    %c0_i32_1 = arith.constant 0 : i32
    return %c0_i32, %arg0, %c0_i32_0 : i32, i32, i32
  }
  func.func @transform_1(%arg0: i32, %arg1: memref<16xf32, #tpu.memory_space<smem>>, %arg2: memref<8xf32, #tpu.memory_space<smem>>, %arg3: memref<8xf32, #tpu.memory_space<smem>>, %arg4: memref<1xf32, #tpu.memory_space<smem>>) -> (i32, i32) {
    %c0_i32 = arith.constant 0 : i32
    %c0_i32_0 = arith.constant 0 : i32
    return %arg0, %c0_i32 : i32, i32
  }
}

</mosaic_0001>

<bundles_post_ra>
// kernel: tpu_custom_call.1
= control target key start
LH: loop header
LB: loop body
LE: loop exit
PB: predicated region body
PF: predicated region fallthrough
CT: control target
= control target key end

     0   :  { %s338_s24 = smov [#allocation3]   ;;  %s339_s25 = smov [#allocation4]   ;;  %s446_s0 = inlined_call_operand.vmem [shape: f32[16], index: 0, kind: input, shape index: {}]   ;;  %s447_s3 = inlined_call_operand.<no memory space> [shape: f32[1], index: 3, kind: input, shape index: {}]   ;;  %s448_s4 = inlined_call_operand.hbm [shape: f32[2,8,128], index: 4, kind: input, shape index: {}]   ;;  %s449_s5 = inlined_call_operand.hbm [shape: f32[8,128], index: 5, kind: output, shape index: {}]   ;;  %s450_s1 = inlined_call_operand.vmem [shape: f32[8], index: 1, kind: input, shape index: {}]   ;;  %s451_s2 = inlined_call_operand.vmem [shape: f32[8], index: 2, kind: input, shape index: {}]  }
   0x1   :  { %s11_s20 = sshll.u32 %s446_s0, 4  ;;  %s16_s23 = sshll.u32 %s450_s1, 4  ;;  %s12_s20 = int_to_ptr.vmem [resolvable:$true] %s11_s20  ;;  %s17_s23 = int_to_ptr.vmem [resolvable:$true] %s16_s23 }
   0x2   :  { %14 = dma.vmem_to_smem %s12_s20, 16, %s338_s24, [#allocation2] }
   0x3   :  { %19 = dma.vmem_to_smem %s17_s23, 16, %s339_s25, [#allocation2] }
   0x4   :  { %s21_s28 = sshll.u32 %s451_s2, 4  ;;  %s340_s29 = smov [#allocation5]   ;;  %s22_s28 = int_to_ptr.vmem [resolvable:$true] %s21_s28 }
   0x5   :  { %24 = dma.vmem_to_smem %s22_s28, 16, %s340_s29, [#allocation2] }
   0x6   :  { %332 = dma.done.wait [#allocation2], 48 }
   0x7   :  { %333 = vsyncadd [#allocation2], 4294967248 }
   0x8   :  { %28 = sfence }
   0x9   :  { %29 = vsyncpa [#allocation8], 0 }
   0xa   :  { %30 = vsyncpa [#allocation9], 0  ;;  %s35_s30 = sshll.u32 %s448_s4, 4  ;;  %s341_s6 = smov [#allocation7]   ;;  %s36_s30 = int_to_ptr.hbm [resolvable:$true] %s35_s30 }
   0xb   :  { %s37_s7 = sshll.u32 %s341_s6, 4  ;;  %s342_s8 = smov 128   ;;  %s38_s7 = int_to_ptr.vmem [resolvable:$true] %s37_s7 }
   0xc   :  { %s343_s9 = smov 8  }
   0xd   :  { %43 = dma.hbm_to_vmem [thread:$0]  %s36_s30, 256, %s38_s7, [#allocation8], %s342_s8, %s342_s8, %s343_s9  }
   0xe   :  { %334 = dma.done.wait [#allocation8], 256  }
   0xf   :  { %335 = vsyncadd [#allocation8], 4294967040  ;;  %s51_s2 = sld [smem:[#allocation3]]  ;;  %v387_v0 = vld [vmem:[#allocation7] sm:$0xff]  ;;  %v389_v1 = vld [vmem:[#allocation7 + $0x8] sm:$0xff]  ;;  %v66_v27 = vstv %s447_s3 }
  0x10   :  { %s194_s10 = sld [smem:[#allocation3 + $0x1]] }
  0x11   :  { %s58_s11 = sld [smem:[#allocation4]] }
  0x12   :  { %s195_s12 = sld [smem:[#allocation3 + $0x2]] }
  0x13   :  { %s196_s13 = sld [smem:[#allocation3 + $0x3]] }
  0x14   :  { %s197_s4 = sld [smem:[#allocation4 + $0x1]] }
  0x15   :  { %v52_v2 = vstv %s51_s2  ;;  %s392_s14 = sld [smem:[#allocation5]] }
  0x16   :  { %v53_v3 = vmul.f32 %v52_v2, %v387_v0  ;;  %v55_v4 = vstv %s194_s10  ;;  %s199_s15 = sld [smem:[#allocation3 + $0x4]] }
  0x17   :  { %v56_v5 = vmul.f32 %v55_v4, %v389_v1  ;;  %v59_v6 = vstv %s58_s11  ;;  %s200_s16 = sld [smem:[#allocation3 + $0x5]] }
  0x18   :  { %v69_v8 = vstv %s195_s12  ;;  %s395_s17 = sld [smem:[#allocation4 + $0x2]] }
  0x19   :  { %v57_v7 = vadd.f32 %v56_v5, %v53_v3  ;;  %v70_v9 = vmul.f32 %v69_v8, %v387_v0  ;;  %v72_v10 = vstv %s196_s13  ;;  %s398_s18 = sld [smem:[#allocation5 + $0x1]]  ;;  %s344_s13 = smov [#allocation10]  }
  0x1a   :  { %v73_v12 = vmul.f32 %v72_v10, %v389_v1  ;;  %s203_s19 = sld [smem:[#allocation3 + $0x6]]  ;;  %v76_v13 = vstv %s197_s4  ;;  %s182_s4 = sshll.u32 %s344_s13, 4  ;;  %s183_s4 = int_to_ptr.vmem [resolvable:$true] %s182_s4 }
  0x1b   :  { %v60_v11 = vadd.f32 %v59_v6, %v57_v7  ;;  %s204_s20 = sld [smem:[#allocation3 + $0x7]]  ;;  %v63_v21 = vstv %s392_s14 }
  0x1c   :  { %v74_v14 = vadd.f32 %v73_v12, %v70_v9  ;;  %v84_v15 = vstv %s199_s15  ;;  %s401_s21 = sld [smem:[#allocation4 + $0x3]] }
  0x1d   :  { %230 = vtanh.f32 %v60_v11  ;;  %v85_v16 = vmul.f32 %v84_v15, %v387_v0  ;;  %v87_v17 = vstv %s200_s16  ;;  %s404_s22 = sld [smem:[#allocation5 + $0x2]]  ;;  %s184_s16 = sshll.u32 %s449_s5, 4  ;;  %s185_s16 = int_to_ptr.hbm [resolvable:$true] %s184_s16 }
  0x1e   :  { %v77_v18 = vadd.f32 %v76_v13, %v74_v14  ;;  %v88_v19 = vmul.f32 %v87_v17, %v389_v1  ;;  %s207_s23 = sld [smem:[#allocation3 + $0x8]]  ;;  %v91_v20 = vstv %s395_s17 }
  0x1f   :  { %s208_s24 = sld [smem:[#allocation3 + $0x9]]  ;;  %v80_v32 = vstv %s398_s18 }
  0x20   :  { %232 = vtanh.f32 %v77_v18  ;;  %v89_v22 = vadd.f32 %v88_v19, %v85_v16  ;;  %v99_v23 = vstv %s203_s19  ;;  %s409_s25 = sld [smem:[#allocation4 + $0x4]] }
  0x21   :  { %v100_v24 = vmul.f32 %v99_v23, %v387_v0  ;;  %v102_v25 = vstv %s204_s20  ;;  %s412_s26 = sld [smem:[#allocation5 + $0x3]] }
  0x22   :  { %v92_v28 = vadd.f32 %v91_v20, %v89_v22  ;;  %v103_v29 = vmul.f32 %v102_v25, %v389_v1  ;;  %s211_s29 = sld [smem:[#allocation3 + $0xa]]  ;;  %v106_v31 = vstv %s401_s21 }
  0x23   :  { %v231_v26 = vpop.eup %230  ;;  %s212_s0 = sld [smem:[#allocation3 + $0xb]]  ;;  %v95_v43 = vstv %s404_s22 }
  0x24   :  { %v64_v30 = vmul.f32 %v231_v26, %v63_v21  ;;  %234 = vtanh.f32 %v92_v28  ;;  %v104_v33 = vadd.f32 %v103_v29, %v100_v24  ;;  %v114_v34 = vstv %s207_s23  ;;  %s420_s1 = sld [smem:[#allocation4 + $0x5]] }
  0x25   :  { %v115_v36 = vmul.f32 %v114_v34, %v387_v0  ;;  %v117_v37 = vstv %s208_s24  ;;  %s423_s3 = sld [smem:[#allocation5 + $0x4]] }
  0x26   :  { %v67_v35 = vadd.f32 %v66_v27, %v64_v30  ;;  %v233_v38 = vpop.eup %232  ;;  %v107_v39 = vadd.f32 %v106_v31, %v104_v33  ;;  %v118_v40 = vmul.f32 %v117_v37, %v389_v1  ;;  %s215_s30 = sld [smem:[#allocation3 + $0xc]]  ;;  %v121_v42 = vstv %s409_s25 }
  0x27   :  { %v81_v41 = vmul.f32 %v233_v38, %v80_v32  ;;  %s216_s6 = sld [smem:[#allocation3 + $0xd]]  ;;  %v110_v54 = vstv %s412_s26 }
  0x28   :  { %236 = vtanh.f32 %v107_v39  ;;  %v119_v44 = vadd.f32 %v118_v40, %v115_v36  ;;  %v129_v45 = vstv %s211_s29  ;;  %s428_s7 = sld [smem:[#allocation4 + $0x6]] }
  0x29   :  { %v82_v46 = vadd.f32 %v81_v41, %v67_v35  ;;  %v130_v47 = vmul.f32 %v129_v45, %v387_v0  ;;  %v132_v48 = vstv %s212_s0  ;;  %s431_s8 = sld [smem:[#allocation5 + $0x5]] }
  0x2a   :  { %v235_v49 = vpop.eup %234  ;;  %v122_v50 = vadd.f32 %v121_v42, %v119_v44  ;;  %v133_v51 = vmul.f32 %v132_v48, %v389_v1  ;;  %s219_s9 = sld [smem:[#allocation3 + $0xe]]  ;;  %v136_v53 = vstv %s420_s1 }
  0x2b   :  { %v96_v52 = vmul.f32 %v235_v49, %v95_v43  ;;  %s220_s2 = sld [smem:[#allocation3 + $0xf]]  ;;  %v125_v3 = vstv %s423_s3 }
  0x2c   :  { %238 = vtanh.f32 %v122_v50  ;;  %v134_v55 = vadd.f32 %v133_v51, %v130_v47  ;;  %v144_v56 = vstv %s215_s30  ;;  %s221_s10 = sld [smem:[#allocation4 + $0x7]] }
  0x2d   :  { %v97_v57 = vadd.f32 %v96_v52, %v82_v46  ;;  %v145_v58 = vmul.f32 %v144_v56, %v387_v0  ;;  %v147_v59 = vstv %s216_s6  ;;  %s218_s11 = sld [smem:[#allocation5 + $0x6]] }
  0x2e   :  { %v237_v60 = vpop.eup %236  ;;  %v137_v61 = vadd.f32 %v136_v53, %v134_v55  ;;  %v148_v62 = vmul.f32 %v147_v59, %v389_v1  ;;  %v151_v2 = vstv %s428_s7  ;;  %s222_s12 = sld [smem:[#allocation5 + $0x7]] }
  0x2f   :  { %v111_v63 = vmul.f32 %v237_v60, %v110_v54  ;;  %v140_v14 = vstv %s431_s8 }
  0x30   :  { %240 = vtanh.f32 %v137_v61  ;;  %v149_v4 = vadd.f32 %v148_v62, %v145_v58  ;;  %v159_v5 = vstv %s219_s9 }
  0x31   :  { %v112_v6 = vadd.f32 %v111_v63, %v97_v57  ;;  %v160_v7 = vmul.f32 %v159_v5, %v387_v0  ;;  %v162_v8 = vstv %s220_s2 }
  0x32   :  { %v239_v9 = vpop.eup %238  ;;  %v152_v10 = vadd.f32 %v151_v2, %v149_v4  ;;  %v163_v11 = vmul.f32 %v162_v8, %v389_v1  ;;  %v166_v13 = vstv %s221_s10 }
  0x33   :  { %v126_v12 = vmul.f32 %v239_v9, %v125_v3  ;;  %v155_v20 = vstv %s218_s11 }
  0x34   :  { %242 = vtanh.f32 %v152_v10  ;;  %v164_v15 = vadd.f32 %v163_v11, %v160_v7  ;;  %v170_v23 = vstv %s222_s12 }
  0x35   :  { %v127_v16 = vadd.f32 %v126_v12, %v112_v6 }
  0x36   :  { %v241_v17 = vpop.eup %240  ;;  %v167_v18 = vadd.f32 %v166_v13, %v164_v15 }
  0x37   :  { %v141_v19 = vmul.f32 %v241_v17, %v140_v14 }
  0x38   :  { %244 = vtanh.f32 %v167_v18 }
  0x39   :  { %v142_v21 = vadd.f32 %v141_v19, %v127_v16 }
  0x3a   :  { %v243_v22 = vpop.eup %242 }
  0x3b   :  { %v156_v0 = vmul.f32 %v243_v22, %v155_v20 }
  0x3d   :  { %v157_v24 = vadd.f32 %v156_v0, %v142_v21 }
  0x3e   :  { %v245_v25 = vpop.eup %244 }
  0x3f   :  { %v171_v26 = vmul.f32 %v245_v25, %v170_v23 }
  0x41   :  { %v172_v1 = vadd.f32 %v171_v26, %v157_v24 }
  0x43   :  { %246 = vtanh.f32 %v172_v1 }
  0x49   :  { %v247_v27 = vpop.eup %246 }
  0x4a   :  { %v174_v28 = vmul.f32 0.5, %v247_v27 }
  0x4c   :  { %v175_v29 = vadd.f32 0.5, %v174_v28 }
  0x4e   :  { %176 = vst [vmem:[#allocation10] sm:$0xff] %v175_v29 }
  0x4f   :  { %187 = dma.vmem_to_hbm [thread:$0]  %s183_s4, 128, %s185_s16, [#allocation9]  }
  0x50   :  { %336 = dma.done.wait [#allocation9], 128  }
  0x51   :  { %337 = vsyncadd [#allocation9], 4294967168 }
  0x52   :  { %192 = vsyncpa [#allocation8], 1 }
  0x53   :  { %193 = vsyncpa [#allocation9], 1 }

</bundles_post_ra>
